<compile_context>
chip_gen: v7x
topology: tpu7x:2x2x1
jax: 0.10.0
libtpu: 0.0.40
codegen_flags: <defaults>
</compile_context>

<pallas_src>
import functools

import jax
import jax.numpy as jnp
from jax.experimental import pallas as pl
from jax.experimental.pallas import tpu as pltpu


def _attention_body(q, k, v, mask, inv_temperature, out_ref, attn_ref):
    # q: (Lq, D), k/v: (L, D), mask: (Lq, L) int8 or None.
    # QK^T on the MXU in the inputs' native dtype, f32 accumulation.
    scores = jax.lax.dot_general(
        q, k, (((1,), (1,)), ((), ())), preferred_element_type=jnp.float32
    )
    scores = scores * inv_temperature  # == (q / temperature) @ k^T

    if mask is not None:
        # masked_fill(attn_mask == 1, -1e9)
        scores = jnp.where(mask != 0, -1000000000.0, scores)

    # numerically stable softmax over keys (f32), matches F.softmax(dim=-1)
    m = jnp.max(scores, axis=-1, keepdims=True)
    e = jnp.exp(scores - m)
    attn = e / jnp.sum(e, axis=-1, keepdims=True)

    # TODO(synk): nn.Dropout(p=0.1) is identity in eval mode; training-mode
    # dropout (PyTorch RNG) is not reproduced here.

    attn_ref[...] = attn.astype(attn_ref.dtype)
    # attn @ V in v's native dtype (keeps the MXU bf16-native for bf16 callers).
    out_ref[...] = jnp.dot(
        attn.astype(v.dtype), v, preferred_element_type=jnp.float32
    ).astype(out_ref.dtype)


def _sdpa_kernel(q_ref, k_ref, v_ref, out_ref, attn_ref, *, inv_temperature):
    _attention_body(
        q_ref[...], k_ref[...], v_ref[...], None, inv_temperature, out_ref, attn_ref
    )


def _sdpa_kernel_masked(
    q_ref, k_ref, v_ref, mask_ref, out_ref, attn_ref, *, inv_temperature
):
    _attention_body(
        q_ref[...],
        k_ref[...],
        v_ref[...],
        mask_ref[...],
        inv_temperature,
        out_ref,
        attn_ref,
    )


def scaled_dot_product_attention(q, k, v, attn_mask=None, *, temperature):
    """Forward pass of pypots ScaledDotProductAttention (eval mode)."""
    B, H, L, D = q.shape
    # Plain Python float so it is inlined as a literal in the kernel jaxpr.
    inv_temperature = float(1.0 / temperature)

    # q-row tile: (8,128)-aligned tiles bound VMEM and give the pipeline enough
    # steps for long sequences; fall back to full L for small/odd lengths.
    if L % 256 == 0:
        lq = 256
    elif L % 128 == 0:
        lq = 128
    else:
        lq = L
    nq = L // lq

    sq = pl.Squeezed()
    q_spec = pl.BlockSpec((sq, sq, lq, D), lambda b, h, i: (b, h, i, 0))
    kv_spec = pl.BlockSpec((sq, sq, L, D), lambda b, h, i: (b, h, 0, 0))
    out_spec = pl.BlockSpec((sq, sq, lq, D), lambda b, h, i: (b, h, i, 0))
    attn_spec = pl.BlockSpec((sq, sq, lq, L), lambda b, h, i: (b, h, i, 0))

    out_shape = (
        jax.ShapeDtypeStruct((B, H, L, D), q.dtype),
        jax.ShapeDtypeStruct((B, H, L, L), q.dtype),
    )

    itemsize = q.dtype.itemsize
    bytes_accessed = (3 * B * H * L * D + B * H * L * D + B * H * L * L) * itemsize

    if attn_mask is None:
        kernel = functools.partial(_sdpa_kernel, inv_temperature=inv_temperature)
        in_specs = [q_spec, kv_spec, kv_spec]
        operands = (q, k, v)
    else:
        # Keep the mask minimal: int8, and keep size-1 batch/head dims at 1 --
        # the index_map reuses block 0 there, so the same (lq, L) tile stays
        # resident across the whole grid instead of being re-DMAed B*H times.
        mask = jnp.asarray(attn_mask)
        if mask.ndim < 4:
            mask = mask.reshape((1,) * (4 - mask.ndim) + mask.shape)
        mask = (mask != 0).astype(jnp.int8)
        mask = jnp.broadcast_to(mask, mask.shape[:2] + (L, L))
        bm, hm = int(mask.shape[0]), int(mask.shape[1])
        mask_spec = pl.BlockSpec(
            (sq, sq, lq, L),
            lambda b, h, i: (b if bm > 1 else 0, h if hm > 1 else 0, i, 0),
        )
        kernel = functools.partial(
            _sdpa_kernel_masked, inv_temperature=inv_temperature
        )
        in_specs = [q_spec, kv_spec, kv_spec, mask_spec]
        operands = (q, k, v, mask)
        bytes_accessed += bm * hm * L * L  # int8 mask

    cost = pl.CostEstimate(
        flops=4 * B * H * L * L * D,
        transcendentals=B * H * L * L,
        bytes_accessed=bytes_accessed,
    )

    out, attn = pl.pallas_call(
        kernel,
        out_shape=out_shape,
        grid_spec=pltpu.PrefetchScalarGridSpec(
            num_scalar_prefetch=0,
            grid=(B, H, nq),
            in_specs=in_specs,
            out_specs=(out_spec, attn_spec),
        ),
        compiler_params=pltpu.CompilerParams(
            dimension_semantics=("parallel", "parallel", "parallel"),
            vmem_limit_bytes=48 * 1024 * 1024,
        ),
        cost_estimate=cost,
    )(*operands)
    return out, attn


def _reference(q, k, v, attn_mask, temperature):
    scores = jnp.einsum("bhqd,bhkd->bhqk", q / temperature, k)
    if attn_mask is not None:
        scores = jnp.where(attn_mask == 1, -1000000000.0, scores)
    attn = jax.nn.softmax(scores, axis=-1)
    out = jnp.einsum("bhqk,bhkd->bhqd", attn, v)
    return out, attn


if __name__ == "__main__":
    B, H, L, D = 2, 4, 8, 32
    temperature = float(D) ** 0.5

    key = jax.random.PRNGKey(0)
    kq, kk, kv_ = jax.random.split(key, 3)
    q = jax.random.normal(kq, (B, H, L, D), dtype=jnp.float32)
    k = jax.random.normal(kk, (B, H, L, D), dtype=jnp.float32)
    v = jax.random.normal(kv_, (B, H, L, D), dtype=jnp.float32)

    # single shared causal mask [1,1,L,L] -> exercises the mask de-dup path
    attn_mask = jnp.triu(jnp.ones((L, L), jnp.int32), k=1)[None, None]

    out, attn = scaled_dot_product_attention(
        q, k, v, attn_mask, temperature=temperature
    )
    jax.block_until_ready((out, attn))
    ref_out, ref_attn = _reference(q, k, v, attn_mask, temperature)
    assert jnp.allclose(out, ref_out, atol=1e-5, rtol=1e-5)
    assert jnp.allclose(attn, ref_attn, atol=1e-5, rtol=1e-5)

    # maskless path (separate pallas_call: no mask streamed from HBM)
    out2, attn2 = scaled_dot_product_attention(q, k, v, None, temperature=temperature)
    jax.block_until_ready((out2, attn2))
    ref_out2, ref_attn2 = _reference(q, k, v, None, temperature)
    assert jnp.allclose(out2, ref_out2, atol=1e-5, rtol=1e-5)
    assert jnp.allclose(attn2, ref_attn2, atol=1e-5, rtol=1e-5)

    # longer sequence exercises the q-tiled grid (L=512 -> two 256-row tiles)
    B3, H3, L3, D3 = 1, 1, 512, 32
    k3 = jax.random.split(jax.random.PRNGKey(1), 3)
    q3 = jax.random.normal(k3[0], (B3, H3, L3, D3), dtype=jnp.float32)
    kk3 = jax.random.normal(k3[1], (B3, H3, L3, D3), dtype=jnp.float32)
    v3 = jax.random.normal(k3[2], (B3, H3, L3, D3), dtype=jnp.float32)
    m3 = jnp.triu(jnp.ones((L3, L3), jnp.int32), k=1)[None, None]
    t3 = float(D3) ** 0.5
    out3, attn3 = scaled_dot_product_attention(q3, kk3, v3, m3, temperature=t3)
    jax.block_until_ready((out3, attn3))
    r_out3, r_attn3 = _reference(q3, kk3, v3, m3, t3)
    assert jnp.allclose(out3, r_out3, atol=1e-5, rtol=1e-5)
    assert jnp.allclose(attn3, r_attn3, atol=1e-5, rtol=1e-5)

    print("KERNEL_OK")
</pallas_src>

<mosaic_0001>
module attributes {stable_mosaic.version = 11 : i64} {
  func.func @_sdpa_kernel_masked(%arg0: i32, %arg1: i32, %arg2: i32, %arg3: memref<1x1x8x32xf32, #tpu.memory_space<vmem>>, %arg4: memref<1x1x8x32xf32, #tpu.memory_space<vmem>>, %arg5: memref<1x1x8x32xf32, #tpu.memory_space<vmem>>, %arg6: memref<1x1x8x8xi8, #tpu.memory_space<vmem>>, %arg7: memref<1x1x8x32xf32, #tpu.memory_space<vmem>>, %arg8: memref<1x1x8x8xf32, #tpu.memory_space<vmem>>) attributes {dimension_semantics = [#tpu.dimension_semantics<parallel>, #tpu.dimension_semantics<parallel>, #tpu.dimension_semantics<parallel>], iteration_bounds = array<i64: 2, 4, 1>, scalar_prefetch = 0 : i64, scratch_operands = 0 : i64, tpu.core_type = #tpu.core_type<tc>, window_params = [{transform_indices = @transform_0, window_bounds = array<i64: 1, 1, 8, 32>}, {transform_indices = @transform_1, window_bounds = array<i64: 1, 1, 8, 32>}, {transform_indices = @transform_2, window_bounds = array<i64: 1, 1, 8, 32>}, {transform_indices = @transform_3, window_bounds = array<i64: 1, 1, 8, 8>}, {transform_indices = @transform_4, window_bounds = array<i64: 1, 1, 8, 32>}, {transform_indices = @transform_5, window_bounds = array<i64: 1, 1, 8, 8>}]} {
    %c0 = arith.constant 0 : index
    %c0_0 = arith.constant 0 : index
    %c0_1 = arith.constant 0 : index
    %c0_2 = arith.constant 0 : index
    %0 = vector.load %arg3[%c0, %c0_0, %c0_1, %c0_2] : memref<1x1x8x32xf32, #tpu.memory_space<vmem>>, vector<1x1x8x32xf32>
    %1 = vector.shape_cast %0 : vector<1x1x8x32xf32> to vector<8x32xf32>
    %c0_3 = arith.constant 0 : index
    %c0_4 = arith.constant 0 : index
    %c0_5 = arith.constant 0 : index
    %c0_6 = arith.constant 0 : index
    %2 = vector.load %arg4[%c0_3, %c0_4, %c0_5, %c0_6] : memref<1x1x8x32xf32, #tpu.memory_space<vmem>>, vector<1x1x8x32xf32>
    %3 = vector.shape_cast %2 : vector<1x1x8x32xf32> to vector<8x32xf32>
    %c0_7 = arith.constant 0 : index
    %c0_8 = arith.constant 0 : index
    %c0_9 = arith.constant 0 : index
    %c0_10 = arith.constant 0 : index
    %4 = vector.load %arg5[%c0_7, %c0_8, %c0_9, %c0_10] : memref<1x1x8x32xf32, #tpu.memory_space<vmem>>, vector<1x1x8x32xf32>
    %5 = vector.shape_cast %4 : vector<1x1x8x32xf32> to vector<8x32xf32>
    %c0_11 = arith.constant 0 : index
    %c0_12 = arith.constant 0 : index
    %c0_13 = arith.constant 0 : index
    %c0_14 = arith.constant 0 : index
    %6 = vector.load %arg6[%c0_11, %c0_12, %c0_13, %c0_14] : memref<1x1x8x8xi8, #tpu.memory_space<vmem>>, vector<1x1x8x8xi8>
    %7 = vector.shape_cast %6 : vector<1x1x8x8xi8> to vector<8x8xi8>
    %cst = arith.constant dense<0.000000e+00> : vector<8x8xf32>
    %8 = tpu.matmul %1, %3, %cst {dimension_numbers = #tpu.dot_dimension_numbers<[1], [1], [0], [0], [0, 0, 1, 0], [], []>} : vector<8x32xf32>, vector<8x32xf32>, vector<8x8xf32> -> vector<8x8xf32>
    %cst_15 = arith.constant 0.176776692 : f32
    %9 = vector.broadcast %cst_15 : f32 to vector<8x8xf32>
    %10 = arith.mulf %8, %9 : vector<8x8xf32>
    %c0_i8 = arith.constant 0 : i8
    %11 = vector.broadcast %c0_i8 : i8 to vector<8x8xi8>
    %12 = arith.cmpi ne, %7, %11 : vector<8x8xi8>
    %cst_16 = arith.constant -1.000000e+09 : f32
    %13 = vector.broadcast %cst_16 : f32 to vector<8x8xf32>
    %14 = arith.select %12, %13, %10 : vector<8x8xi1>, vector<8x8xf32>
    %cst_17 = arith.constant dense<0xFF800000> : vector<8xf32>
    %15 = vector.multi_reduction <maximumf>, %14, %cst_17 [1] : vector<8x8xf32> to vector<8xf32>
    %16 = vector.shape_cast %15 : vector<8xf32> to vector<8x1xf32>
    %17 = vector.broadcast %16 : vector<8x1xf32> to vector<8x8xf32>
    %18 = arith.subf %14, %17 : vector<8x8xf32>
    %19 = math.exp %18 : vector<8x8xf32>
    %cst_18 = arith.constant dense<0.000000e+00> : vector<8xf32>
    %20 = vector.multi_reduction <add>, %19, %cst_18 [1] : vector<8x8xf32> to vector<8xf32>
    %21 = vector.shape_cast %20 : vector<8xf32> to vector<8x1xf32>
    %22 = vector.broadcast %21 : vector<8x1xf32> to vector<8x8xf32>
    %23 = arith.divf %19, %22 : vector<8x8xf32>
    %c0_19 = arith.constant 0 : index
    %c0_20 = arith.constant 0 : index
    %c0_21 = arith.constant 0 : index
    %c0_22 = arith.constant 0 : index
    %24 = vector.load %arg8[%c0_19, %c0_20, %c0_21, %c0_22] : memref<1x1x8x8xf32, #tpu.memory_space<vmem>>, vector<1x1x8x8xf32>
    %25 = vector.shape_cast %24 : vector<1x1x8x8xf32> to vector<8x8xf32>
    %26 = vector.shape_cast %23 : vector<8x8xf32> to vector<1x1x8x8xf32>
    tpu.vector_store %arg8[%c0_19, %c0_20, %c0_21, %c0_22], %26 {strides = array<i32>} : memref<1x1x8x8xf32, #tpu.memory_space<vmem>>, vector<1x1x8x8xf32>,
    %cst_23 = arith.constant dense<0.000000e+00> : vector<8x32xf32>
    %27 = tpu.matmul %23, %5, %cst_23 {dimension_numbers = #tpu.dot_dimension_numbers<[1], [0], [0], [1], [0, 0, 1, 1], [], []>} : vector<8x8xf32>, vector<8x32xf32>, vector<8x32xf32> -> vector<8x32xf32>
    %c0_24 = arith.constant 0 : index
    %c0_25 = arith.constant 0 : index
    %c0_26 = arith.constant 0 : index
    %c0_27 = arith.constant 0 : index
    %28 = vector.load %arg7[%c0_24, %c0_25, %c0_26, %c0_27] : memref<1x1x8x32xf32, #tpu.memory_space<vmem>>, vector<1x1x8x32xf32>
    %29 = vector.shape_cast %28 : vector<1x1x8x32xf32> to vector<8x32xf32>
    %30 = vector.shape_cast %27 : vector<8x32xf32> to vector<1x1x8x32xf32>
    tpu.vector_store %arg7[%c0_24, %c0_25, %c0_26, %c0_27], %30 {strides = array<i32>} : memref<1x1x8x32xf32, #tpu.memory_space<vmem>>, vector<1x1x8x32xf32>,
    return
  }
  func.func @transform_0(%arg0: i32, %arg1: i32, %arg2: i32) -> (i32, i32, i32, i32) {
    %c0_i32 = arith.constant 0 : i32
    %c0_i32_0 = arith.constant 0 : i32
    return %arg0, %arg1, %arg2, %c0_i32 : i32, i32, i32, i32
  }
  func.func @transform_1(%arg0: i32, %arg1: i32, %arg2: i32) -> (i32, i32, i32, i32) {
    %c0_i32 = arith.constant 0 : i32
    %c0_i32_0 = arith.constant 0 : i32
    %c0_i32_1 = arith.constant 0 : i32
    return %arg0, %arg1, %c0_i32, %c0_i32_0 : i32, i32, i32, i32
  }
  func.func @transform_2(%arg0: i32, %arg1: i32, %arg2: i32) -> (i32, i32, i32, i32) {
    %c0_i32 = arith.constant 0 : i32
    %c0_i32_0 = arith.constant 0 : i32
    %c0_i32_1 = arith.constant 0 : i32
    return %arg0, %arg1, %c0_i32, %c0_i32_0 : i32, i32, i32, i32
  }
  func.func @transform_3(%arg0: i32, %arg1: i32, %arg2: i32) -> (i32, i32, i32, i32) {
    %c0_i32 = arith.constant 0 : i32
    %c0_i32_0 = arith.constant 0 : i32
    %c0_i32_1 = arith.constant 0 : i32
    %c0_i32_2 = arith.constant 0 : i32
    return %c0_i32, %c0_i32_0, %arg2, %c0_i32_1 : i32, i32, i32, i32
  }
  func.func @transform_4(%arg0: i32, %arg1: i32, %arg2: i32) -> (i32, i32, i32, i32) {
    %c0_i32 = arith.constant 0 : i32
    %c0_i32_0 = arith.constant 0 : i32
    return %arg0, %arg1, %arg2, %c0_i32 : i32, i32, i32, i32
  }
  func.func @transform_5(%arg0: i32, %arg1: i32, %arg2: i32) -> (i32, i32, i32, i32) {
    %c0_i32 = arith.constant 0 : i32
    %c0_i32_0 = arith.constant 0 : i32
    return %arg0, %arg1, %arg2, %c0_i32 : i32, i32, i32, i32
  }
}

</mosaic_0001>

<bundles_post_ra>
// kernel: tpu_custom_call.1
= control target key start
LH: loop header
LB: loop body
LE: loop exit
PB: predicated region body
PF: predicated region fallthrough
CT: control target
= control target key end

     0   :  { %s1518_s0 = inlined_call_operand.hbm [shape: f32[2,4,8,32], index: 0, kind: input, shape index: {}]   ;;  %s1519_s1 = inlined_call_operand.hbm [shape: f32[2,4,8,32], index: 1, kind: input, shape index: {}]   ;;  %s1520_s2 = inlined_call_operand.hbm [shape: f32[2,4,8,32], index: 2, kind: input, shape index: {}]   ;;  %s1521_s3 = inlined_call_operand.vmem [shape: s8[1,1,8,8], index: 3, kind: input, shape index: {}]   ;;  %s1522_s4 = inlined_call_operand.hbm [shape: f32[2,4,8,32], index: 4, kind: output, shape index: {0}]   ;;  %s1523_s5 = inlined_call_operand.hbm [shape: f32[2,4,8,8], index: 5, kind: output, shape index: {1}]  }
   0x1   :  { %1536 = sst [smem:[#allocation23_spill]] %s1519_s1 }
   0x2   :  { %11 = vsyncpa [#allocation3], 0 }
   0x3   :  { %13 = vsyncpa [#allocation3 + $0x1], 0 }
   0x4   :  { %14 = vsyncpa [#allocation6], 0 }
   0x5   :  { %16 = vsyncpa [#allocation6 + $0x1], 0 }
   0x6   :  { %17 = vsyncpa [#allocation4], 0 }
   0x7   :  { %19 = vsyncpa [#allocation4 + $0x1], 0 }
   0x8   :  { %20 = vsyncpa [#allocation10], 0 }
   0x9   :  { %22 = vsyncpa [#allocation10 + $0x1], 0  ;;  %s1191_s18 = smov 0   ;;  %s1193_s19 = smov 0  }
   0xa   :  { %s1195_s20 = smov 0   ;;  %s1197_s21 = smov 0  }
   0xb   :  { %s1199_s22 = smov 0   ;;  %s1201_s23 = smov 0  }
   0xc   :  { %s1203_s24 = smov 0   ;;  %s1205_s25 = smov 0  }
   0xd LB: > { %1537 = sst [smem:[#allocation15_spill]] %s1123_s18  ;;  %s1232_s26 = sadd.s32 4294967295, %s1151_s25   ;;  %s1151_s25 = sphi %s1205_s25, %s28_s25   ;;  %s1147_s24 = sphi %s1203_s24, %s1568_s24   ;;  %s1143_s23 = sphi %s1201_s23, %s1567_s23   ;;  %s1139_s22 = sphi %s1199_s22, %s1566_s22   ;;  %s1135_s21 = sphi %s1197_s21, %s1565_s21   ;;  %s1131_s20 = sphi %s1195_s20, %s1571_s20   ;;  %s1127_s19 = sphi %s1193_s19, %s1570_s19   ;;  %s1123_s18 = sphi %s1191_s18, %s1569_s18  }
   0xe   : > { %1538 = sst [smem:[#allocation16_spill]] %s1143_s23  ;;  %s783_s27 = sadd.s32 4294967294, %s1151_s25  }
   0xf   : > { %1539 = sst [smem:[#allocation17_spill]] %s1147_s24  ;;  %s43_s28 = sadd.s32 1, %s1143_s23 }
  0x10   : > { %1540 = sst [smem:[#allocation18_spill]] %s1151_s25  ;;  %s47_s29 = sadd.s32 1, %s1147_s24 }
  0x11   : > { %p45_p0 = scmp.ge.s32.totalorder %s43_s28, 4  ;;  %s58_s30 = sadd.s32 1, %s1131_s20 }
  0x12   : > { %p65_p1 = scmp.ne.s32.totalorder %s1131_s20, %s1127_s19  ;;  %p66_p2 = scmp.eq.s32.totalorder %s1151_s25, 0 }
  0x13   : > { %s1573_s28 = smov (%p45_p0, %s43_s28), 0  ;;  %s1575_s29 = smov (!%p45_p0, %s47_s29), %s1147_s24 }
  0x14   : > { %1541 = sst [smem:[#allocation19_spill]] %s1573_s28  ;;  %s52_s6 = ssub.s32 %s1143_s23, %s1573_s28 }
  0x15   : > { %p1246_p3 = por %p66_p2, %p65_p1  ;;  %p49_p4 = scmp.ge.s32.totalorder %s1575_s29, 2 }
  0x16   : > { %p71_p5 = scmp.ne.s32.totalorder %s1127_s19, %s1123_s18  ;;  %p72_p6 = scmp.eq.s32.totalorder %s1232_s26, 0 }
  0x17   : > { %p181_p7 = scmp.eq.s32.totalorder %s1232_s26, 7  ;;  %s1577_s29 = smov (%p49_p4, %s1575_s29), 0 }
  0x18   : > { %1543 = sst [smem:[#allocation20_spill]] %s1577_s29  ;;  %p1256_p8 = por %p72_p6, %p71_p5 }
  0x19   : > { %p1260_p9 = por %p181_p7, %p65_p1  ;;  %s51_s10 = ssub.s32 %s1147_s24, %s1577_s29 }
  0x1a   : > { %s1544_s8 = scalar_select %p1256_p8, 1, 0 }
  0x1b   : > { %s1545_s9 = scalar_select %p1260_p9, 1, 0 }
  0x1c   : > { %p187_p10 = scmp.eq.s32.totalorder %s783_s27, 7  ;;  %s53_s11 = sor.u32 %s52_s6, %s51_s10 }
  0x1d   : > { %p56_p11 = scmp.eq.s32.totalorder %s53_s11, 0  ;;  %p854_p13 = scmp.lt.s32.totalorder %s1151_s25, 8 }
  0x1e   : > { %p1266_p12 = por %p187_p10, %p71_p5  ;;  %s1525_s13 = sand.u32 1, %s1131_s20  }
  0x1f   : > { %s1273_s14 = scalar_select %p56_p11, %s1131_s20, %s58_s30  }
  0x20   : > { %s1546_s12 = scalar_select %p1266_p12, 1, 0 }
  0x21   : > { %1548 = sst [smem:[#allocation22_spill]] %s1273_s14  ;;  %s1277_s15 = sshll.u32 %s1525_s13, 3 }
  0x22   : > { %1547 = sst [smem:[#allocation21_spill]] %s1546_s12  ;;  %s788_s16 = sshll.u32 %s1147_s24, 2 }
  0x23   : > { %s254_s17 = sadd.s32 %s1143_s23, %s788_s16  ;;  %p1283_p0 = pnand %p854_p13, %p1246_p3 }
  0x24   : > { %s1287_s6 = sshll.u32 %s254_s17, 7  ;;  %s265_s10 = sand.u32 1, %s1151_s25  }
  0x25   : > { %s1549_s27 = scalar_select %p1283_p0, 1, 0 }
  0x26   : > { %s1550_s1 = sld [smem:[#allocation23_spill]]  ;;  %s269_s16 = scalar_lea.vmem [#allocation5], %s1277_s15 }
  0x27   : > { %s278_s7 = sshll.u32 %s269_s16, 4  ;;  %s1301_s13 = scalar_lea.sflag [#allocation6], %s265_s10  ;;  %s1298_s7 = int_to_ptr.vmem [resolvable:$true] %s278_s7 }
  0x28   : > { %p1307_p4 = pneg %p1283_p0 }
  0x2c   : > { %s1294_s30 = scalar_lea.hbm %s1550_s1, %s1287_s6  ;;  %s932_s16 = scalar_lea.hbm %s1550_s1, 1024 }
  0x2d   : > { %s927_s17 = scalar_lea.hbm %s1294_s30, 128  ;;  %p933_p7 = scmp.lt.u32.totalorder %s1294_s30, %s1550_s1 }
  0x2e   : > { %p928_p3 = scmp.ne.s32.totalorder %s1294_s30, %s927_s17  ;;  %p934_p10 = scmp.lt.u32.totalorder %s932_s16, %s927_s17 }
  0x2f   : > { %p936_p13 = scmp.lt.u32.totalorder %s927_s17, %s1294_s30 }
  0x30   : > { %p930_p5 = pnand %p1307_p4, %p928_p3  ;;  %p935_p11 = por %p934_p10, %p933_p7 }
  0x32   : > { %p931_p6 = pneg %p930_p5  ;;  %p937_p1 = por %p936_p13, %p935_p11 }
  0x34   : > { %p938_p2 = pnand %p937_p1, %p931_p6 }
  0x36   : > { %941 = shalt.err (!%p938_p2)
}
  0x37   : > { %s942_s10 = scalar_lea.vmem %s1298_s7, 128  ;;  %s1153_s29 = smov [#allocation5]  }
  0x38   : > { %p943_p3 = scmp.ne.s32.totalorder %s1298_s7, %s942_s10  ;;  %s947_s11 = sshll.u32 %s1153_s29, 4  ;;  %s948_s11 = int_to_ptr.vmem [resolvable:$false] %s947_s11 }
  0x39   : > { %s949_s23 = scalar_lea.vmem %s948_s11, 256  ;;  %p950_p9 = scmp.lt.s32.totalorder %s1298_s7, %s948_s11 }
  0x3a   : > { %p945_p5 = pnand %p943_p3, %p1307_p4  ;;  %p951_p8 = scmp.lt.s32.totalorder %s949_s23, %s942_s10 }
  0x3c   : > { %p946_p12 = pneg %p945_p5  ;;  %p952_p7 = por %p951_p8, %p950_p9 }
  0x3e   : > { %p953_p10 = pnand %p952_p7, %p946_p12 }
  0x40   : > { %956 = shalt.err (!%p953_p10)
}
  0x41   : > { %843 = dma.hbm_to_vmem [thread:$0]  (!%p1283_p0), %s1294_s30, 128, %s1298_s7, %s1301_s13  }
  0x42   : > { %p1552_p1 = scmp.lt.s32.totalorder %s1151_s25, 9  ;;  %p1553_p2 = scmp.ge.s32.totalorder %s1151_s25, 1 }
  0x43   : > { %s1343_s10 = scalar_lea.hbm %s1518_s0, %s1287_s6  ;;  %s248_s29 = scalar_lea.vmem [#allocation2], %s1277_s15 }
  0x44   : > { %p1335_p6 = pnand %p1553_p2, %p1552_p1  ;;  %s258_s11 = sshll.u32 %s248_s29, 4  ;;  %s1346_s11 = int_to_ptr.vmem [resolvable:$true] %s258_s11 }
  0x45   : > { %s1352_s23 = scalar_lea.hbm %s1520_s2, %s1287_s6  ;;  %s1555_s1 = sand.u32 1, %s1131_s20  }
  0x46   : > { %s1554_s24 = scalar_select %p1335_p6, 1, 0 }
  0x47   : > { %s245_s14 = scalar_lea.sflag [#allocation3], %s1555_s1  ;;  %s957_s12 = scalar_lea.hbm %s1343_s10, 128 }
  0x48   : > { %p958_p8 = scmp.ne.s32.totalorder %s1343_s10, %s957_s12  ;;  %s962_s18 = scalar_lea.hbm %s1518_s0, 1024 }
  0x49   : > { %p963_p11 = scmp.lt.u32.totalorder %s1343_s10, %s1518_s0  ;;  %p964_p13 = scmp.lt.u32.totalorder %s962_s18, %s957_s12 }
  0x4a   : > { %p960_p9 = pnand %p958_p8, %p1307_p4  ;;  %p966_p5 = scmp.lt.u32.totalorder %s957_s12, %s1343_s10 }
  0x4b   : > { %p965_p3 = por %p964_p13, %p963_p11 }
  0x4c   : > { %p961_p12 = pneg %p960_p9 }
  0x4d   : > { %p967_p7 = por %p966_p5, %p965_p3 }
  0x4f   : > { %p968_p10 = pnand %p967_p7, %p961_p12 }
  0x51   : > { %971 = shalt.err (!%p968_p10)
}
  0x52   : > { %s972_s1 = scalar_lea.vmem %s1346_s11, 128  ;;  %s1154_s6 = smov [#allocation2]  }
  0x53   : > { %p973_p1 = scmp.ne.s32.totalorder %s1346_s11, %s972_s1  ;;  %s977_s30 = sshll.u32 %s1154_s6, 4  ;;  %s978_s30 = int_to_ptr.vmem [resolvable:$false] %s977_s30 }
  0x54   : > { %s979_s25 = scalar_lea.vmem %s978_s30, 256  ;;  %p980_p9 = scmp.lt.s32.totalorder %s1346_s11, %s978_s30 }
  0x55   : > { %p975_p2 = pnand %p973_p1, %p1307_p4  ;;  %p981_p6 = scmp.lt.s32.totalorder %s979_s25, %s972_s1 }
  0x57   : > { %p976_p8 = pneg %p975_p2  ;;  %p982_p11 = por %p981_p6, %p980_p9 }
  0x59   : > { %p983_p13 = pnand %p982_p11, %p976_p8 }
  0x5b   : > { %986 = shalt.err (!%p983_p13)
}
  0x5c   : > { %840 = dma.hbm_to_vmem [thread:$0]  (!%p1283_p0), %s1343_s10, 128, %s1346_s11, %s245_s14  }
  0x5d   : > { %s289_s18 = scalar_lea.vmem [#allocation7], %s1277_s15  ;;  %s987_s7 = scalar_lea.hbm %s1352_s23, 128 }
  0x5e   : > { %s298_s12 = sshll.u32 %s289_s18, 4  ;;  %p988_p12 = scmp.ne.s32.totalorder %s1352_s23, %s987_s7  ;;  %s299_s12 = int_to_ptr.vmem [resolvable:$true] %s298_s12 }
  0x5f   : > { %s992_s29 = scalar_lea.hbm %s1520_s2, 1024  ;;  %p993_p5 = scmp.lt.u32.totalorder %s1352_s23, %s1520_s2 }
  0x60   : > { %p990_p6 = pnand %p988_p12, %p1307_p4  ;;  %p994_p7 = scmp.lt.u32.totalorder %s992_s29, %s987_s7 }
  0x61   : > { %p996_p1 = scmp.lt.u32.totalorder %s987_s7, %s1352_s23 }
  0x62   : > { %p991_p3 = pneg %p990_p6  ;;  %p995_p10 = por %p994_p7, %p993_p5 }
  0x64   : > { %p997_p2 = por %p996_p1, %p995_p10 }
  0x66   : > { %p998_p8 = pnand %p997_p2, %p991_p3 }
  0x68   : > { %1001 = shalt.err (!%p998_p8)
}
  0x69   : > { %s1002_s14 = scalar_lea.vmem %s299_s12, 128  ;;  %s1155_s15 = smov [#allocation7]  }
  0x6a   : > { %p1003_p9 = scmp.ne.s32.totalorder %s299_s12, %s1002_s14  ;;  %s1007_s10 = sshll.u32 %s1155_s15, 4  ;;  %s1008_s10 = int_to_ptr.vmem [resolvable:$false] %s1007_s10 }
  0x6b   : > { %s1009_s11 = scalar_lea.vmem %s1008_s10, 256  ;;  %p1010_p12 = scmp.lt.s32.totalorder %s299_s12, %s1008_s10 }
  0x6c   : > { %p1005_p11 = pnand %p1003_p9, %p1307_p4  ;;  %p1011_p6 = scmp.lt.s32.totalorder %s1009_s11, %s1002_s14 }
  0x6e   : > { %p1006_p13 = pneg %p1005_p11  ;;  %p1012_p0 = por %p1011_p6, %p1010_p12 }
  0x70   : > { %p1013_p5 = pnand %p1012_p0, %p1006_p13 }
  0x72   : > { %1016 = shalt.err (!%p1013_p5)
}
  0x73   : > { %p1556_p7 = scmp.ne.s32.totalorder %s1549_s27, 0  ;;  %p1557_p3 = scmp.ne.s32.totalorder %s1554_s24, 0 }
  0x74   : > { %s1399_s28 = sand.u32 (!%p1557_p3), 1, %s1127_s19   ;;  %p1558_p0 = scmp.ne.s32.totalorder (!%p1557_p3), %s1544_s8, 0 }
  0x75   : > { %846 = dma.hbm_to_vmem [thread:$0]  (!%p1556_p7), %s1352_s23, 128, %s299_s12, %s1301_s13  }
  0x76   : > { %307 = sbr.rel (%p1557_p3) target bundleno = 890 (0x37a), region = 36  ;;  %s1402_s30 = sshll.u32 (!%p1557_p3), %s1399_s28, 3 }
  0x77   : > { %s310_s25 = scalar_lea.sflag (!%p1557_p3), [#allocation3], %s1399_s28  ;;  %s313_s18 = scalar_lea.vmem (!%p1557_p3), [#allocation2], %s1402_s30 }
  0x7d   : > { %1106 = dma.done.wait (%p1558_p0), %s310_s25, 128  }
  0x7e   : > { %1108 = vsyncadd (%p1558_p0), %s310_s25, 4294967168  ;;  %s318_s13 = sand.u32 1, %s1232_s26   ;;  %s322_s24 = scalar_lea.vmem [#allocation5], %s1402_s30 }
  0x7f   : > { %s319_s27 = scalar_lea.sflag [#allocation6], %s318_s13 }
  0x80   : > { %1110 = dma.done.wait (%p1558_p0), %s319_s27, 256  }
  0x81   : > { %1112 = vsyncadd (%p1558_p0), %s319_s27, 4294967040  ;;  %v1156_v0 = vmov 0.0   ;;  %vm1157_vm0 = vmmov 0   ;;  %vm387_vm1 = vcmask 261120   ;;  %v384_v1 = vld [vmem:[%s322_s24] sm:$0xff]  ;;  %v383_v2 = vld [vmem:[%s313_s18] sm:$0xff] }
  0x82   : > { %817 = vmatprep.subr.mxu0 %v1156_v0  ;;  %819 = vmatprep.mubr.msk.f32.mxu0 %vm1157_vm0, %v1156_v0  ;;  %v386_v3 = vld [vmem:[%s1521_s3] sm:$0x3]  ;;  %v1158_v4 = vmov 0   ;;  %vm470_vm4 = vcmask 64512   ;;  %s331_s8 = scalar_lea.vmem [#allocation7], %s1402_s30  ;;  %s376_s12 = scalar_lea.vmem [#allocation9], %s1402_s30 }
  0x83   : > { %822 = vmatprep.subr.mxu1 %v1156_v0  ;;  %824 = vmatprep.mubr.msk.f32.mxu1 %vm1157_vm0, %v1156_v0  ;;  %vm465_vm2 = vnez %v386_v3  ;;  %v385_v17 = vld [vmem:[%s331_s8] sm:$0xff]  ;;  %s807_s7 = sshll.u32 %s1139_s22, 2  ;;  %s595_s14 = sshll.u32 %s376_s12, 4  ;;  %s596_s14 = int_to_ptr.vmem [resolvable:$true] %s595_s14 }
  0x84   : > { %818 = vmatpush3.xpose.msk.msra.mxu0 %vm387_vm1, %v384_v1  ;;  %v466_v5 = vsel %vm465_vm2, 16843009, %v1158_v4  ;;  %823 = vmatpush3.msra.mxu1 %v385_v17  ;;  %s1429_s17 = sadd.s32 %s1135_s21, %s807_s7  ;;  %s563_s15 = scalar_lea.sflag [#allocation10], %s1399_s28 }
  0x85   : > { %v467_v6 = vunpack.c.0.s8 %v466_v5  ;;  %s808_s16 = sshll.u32 %s1429_s17, 7  ;;  %s1017_s10 = scalar_lea.vmem %s596_s14, 128 }
  0x86   : > { %s1437_s6 = scalar_lea.hbm %s1523_s5, %s808_s16  ;;  %p1018_p4 = scmp.ne.s32.totalorder %s596_s14, %s1017_s10 }
  0x87   : > { %820 = vmatmul.mubr.msk.f32.vlgmr.msra.gmra.mrb[0].mxu0 %vm387_vm1, %v383_v2  ;;  %vm468_vm3 = vcmp.ne.s32.totalorder %v467_v6, 0  ;;  %p1559_p10 = scmp.ne.s32.totalorder %s1545_s9, 0  ;;  %s1159_s22 = smov [#allocation9]  }
  0x88   : > { %s1021_s21 = sshll.u32 %s1159_s22, 4  ;;  %s1022_s21 = int_to_ptr.vmem [resolvable:$false] %s1021_s21 }
  0x89   : > { %p1019_p1 = pnand %p1018_p4, %p1559_p10  ;;  %s1023_s11 = scalar_lea.vmem %s1022_s21, 256 }
  0x8a   : > { %p1024_p8 = scmp.lt.s32.totalorder %s596_s14, %s1022_s21  ;;  %p1025_p9 = scmp.lt.s32.totalorder %s1023_s11, %s1017_s10 }
  0x8b   : > { %p1020_p2 = pneg %p1019_p1 }
  0x8c   : > { %p1026_p11 = por %p1025_p9, %p1024_p8 }
  0x8e   : > { %p1027_p13 = pnand %p1026_p11, %p1020_p2 }
 0x15a   : > { %v460_v7 = vpop.f32.mrb[0].mxu0 }
 0x15b   : > { %v464_v8 = vmul.f32 0.17677669, %v460_v7  ;;  %v821_v9 = vpop.f32.mrb[1].mxu0 }
 0x15d   : > { %v469_v10 = vsel %vm468_vm3, -1e+09, %v464_v8 }
 0x15e   : > { %v471_v11 = vsel %vm470_vm4, %v469_v10, -inf }
 0x15f   : > { %472 = vmax.xlane.f32.xlu0 %v471_v11 }
 0x1ec   : > { %v473_v12 = vpop.xlane.xlu0 %472 }
 0x1ed   : > { %v474_v13 = vsub.f32 %v469_v10, %v473_v12 }
 0x1ef   : > { %v475_v14 = vmul.f32 1.442695, %v474_v13 }
 0x1f1   : > { %923 = vpow2.f32 %v475_v14 }
 0x1fb   : > { %v924_v15 = vpop.eup %923 }
 0x1fc   : > { %v477_v16 = vsel %vm470_vm4, %v924_v15, 0.0 }
 0x1fd   : > { %478 = vadd.xlane.f32.xlu0 %v477_v16 }
 0x28a   : > { %v479_v18 = vpop.xlane.xlu0 %478 }
 0x28b   : > { %925 = vrcp.f32 %v479_v18 }
 0x295   : > { %v926_v19 = vpop.eup %925 }
 0x296   : > { %v481_v20 = vmul.f32 %v926_v19, %v924_v15 }
 0x298   : > { %825 = vmatmul.mubr.msk.f32.vlgmr.msra.gmra.mrb[0].mxu1 %vm470_vm4, %v481_v20  ;;  %482 = vst.msk [vmem:[%s376_s12] sm:$0xff] %vm470_vm4, %v481_v20 }
 0x299   : > { %1030 = shalt.err (!%p1027_p13)
}
 0x29a   : > { %s1031_s25 = scalar_lea.hbm %s1437_s6, 128  ;;  %s1035_s27 = scalar_lea.hbm %s1523_s5, 1024 }
 0x29b   : > { %p1032_p12 = scmp.ne.s32.totalorder %s1437_s6, %s1031_s25  ;;  %p1036_p7 = scmp.lt.u32.totalorder %s1437_s6, %s1523_s5 }
 0x29c   : > { %p1037_p3 = scmp.lt.u32.totalorder %s1035_s27, %s1031_s25  ;;  %p1039_p4 = scmp.lt.u32.totalorder %s1031_s25, %s1437_s6 }
 0x29d   : > { %p1033_p6 = pnand %p1032_p12, %p1559_p10 }
 0x29e   : > { %p1038_p0 = por %p1037_p3, %p1036_p7 }
 0x29f   : > { %p1034_p5 = pneg %p1033_p6 }
 0x2a0   : > { %p1040_p1 = por %p1039_p4, %p1038_p0 }
 0x2a2   : > { %p1041_p2 = pnand %p1040_p1, %p1034_p5 }
 0x2a4   : > { %1044 = shalt.err (!%p1041_p2)
}
 0x2a5   : > { %834 = dma.vmem_to_hbm [thread:$0]  (%p1559_p10), %s596_s14, 128, %s1437_s6, %s563_s15  }
 0x2a6   : > { %s369_s23 = scalar_lea.vmem [#allocation8], %s1402_s30  ;;  %s1463_s29 = scalar_lea.hbm %s1522_s4, %s808_s16 }
 0x2a7   : > { %s579_s8 = sshll.u32 %s369_s23, 4  ;;  %s558_s1 = scalar_lea.sflag [#allocation4], %s1399_s28  ;;  %s1465_s8 = int_to_ptr.vmem [resolvable:$true] %s579_s8 }
 0x2a8   : > { %s1045_s10 = scalar_lea.vmem %s1465_s8, 128  ;;  %s1160_s30 = smov [#allocation8]  }
 0x2a9   : > { %p1046_p8 = scmp.ne.s32.totalorder %s1465_s8, %s1045_s10  ;;  %s1049_s17 = sshll.u32 %s1160_s30, 4  ;;  %s1050_s17 = int_to_ptr.vmem [resolvable:$false] %s1049_s17 }
 0x2aa   : > { %s1051_s16 = scalar_lea.vmem %s1050_s17, 256  ;;  %p1052_p13 = scmp.lt.s32.totalorder %s1465_s8, %s1050_s17 }
 0x2ab   : > { %p1047_p9 = pnand %p1046_p8, %p1559_p10  ;;  %p1053_p12 = scmp.lt.s32.totalorder %s1051_s16, %s1045_s10 }
 0x2ad   : > { %p1048_p11 = pneg %p1047_p9  ;;  %p1054_p6 = por %p1053_p12, %p1052_p13 }
 0x2af   : > { %p1055_p5 = pnand %p1054_p6, %p1048_p11 }
 0x36b   : > { %v552_v21 = vpop.f32.mrb[0].mxu1 }
 0x36c   : > { %556 = vst.msk [vmem:[%s369_s23] sm:$0xff] %vm387_vm1, %v552_v21  ;;  %v826_v22 = vpop.f32.mrb[1].mxu1 }
 0x36d   : > { %1058 = shalt.err (!%p1055_p5)
}
 0x36e   : > { %s1059_s28 = scalar_lea.hbm %s1463_s29, 128  ;;  %s1063_s15 = scalar_lea.hbm %s1522_s4, 1024 }
 0x36f   : > { %p1060_p7 = scmp.ne.s32.totalorder %s1463_s29, %s1059_s28  ;;  %p1064_p4 = scmp.lt.u32.totalorder %s1463_s29, %s1522_s4 }
 0x370   : > { %p1065_p1 = scmp.lt.u32.totalorder %s1063_s15, %s1059_s28  ;;  %p1067_p8 = scmp.lt.u32.totalorder %s1059_s28, %s1463_s29 }
 0x371   : > { %p1061_p3 = pnand %p1060_p7, %p1559_p10 }
 0x372   : > { %p1066_p2 = por %p1065_p1, %p1064_p4 }
 0x373   : > { %p1062_p0 = pneg %p1061_p3 }
 0x374   : > { %p1068_p9 = por %p1067_p8, %p1066_p2 }
 0x376   : > { %p1069_p11 = pnand %p1068_p9, %p1062_p0 }
 0x378   : > { %1072 = shalt.err (!%p1069_p11)
}
 0x379   : > { %833 = dma.vmem_to_hbm [thread:$0]  (%p1559_p10), %s1465_s8, 128, %s1463_s29, %s558_s1  }
 0x37a PF: > { %s1560_s11 = sld [smem:[#allocation18_spill]]  ;;  %s1561_s25 = sld [smem:[#allocation15_spill]] }
 0x37b   : > { %s1562_s18 = sld [smem:[#allocation21_spill]] }
 0x380   : > { %p855_p13 = scmp.ge.s32.totalorder %s1560_s11, 2  ;;  %s607_s13 = sand.u32 1, %s1561_s25  }
 0x381   : > { %p1563_p12 = scmp.ne.s32.totalorder %s1562_s18, 0  ;;  %s608_s27 = scalar_lea.sflag [#allocation4], %s607_s13 }
 0x383   : > { %p848_p6 = pnand %p855_p13, %p1563_p12 }
 0x385   : > { %1114 = dma.done.wait (!%p848_p6), %s608_s27, 128  }
 0x386   : > { %1116 = vsyncadd (!%p848_p6), %s608_s27, 4294967168  ;;  %s617_s24 = scalar_lea.sflag [#allocation10], %s607_s13 }
 0x387   : > { %1118 = dma.done.wait (!%p848_p6), %s617_s24, 128  }
 0x388   : > { %1120 = vsyncadd (!%p848_p6), %s617_s24, 4294967168  ;;  %s28_s25 = sadd.s32 1, %s1560_s11   ;;  %s1564_s9 = sld [smem:[#allocation22_spill]] }
 0x389   : > { %p25_p5 = scmp.ge.s32.totalorder %s28_s25, 10   ;;  %s1565_s21 = sld [smem:[#allocation16_spill]] }
 0x38a   : > { %s1566_s22 = sld [smem:[#allocation17_spill]]  ;;  %s1567_s23 = sld [smem:[#allocation19_spill]] }
 0x38b   : > { %s1568_s24 = sld [smem:[#allocation20_spill]]  ;;  %s1569_s18 = smov %s1127_s19 }
 0x38c   : > { %s1570_s19 = smov %s1131_s20  ;;  %27 = sbr.rel (!%p25_p5) target bundleno = 13 (0xd), region = 125 }
 0x38e   : > { %s1571_s20 = smov %s1564_s9 }
 0x393   :  { %622 = vsyncpa [#allocation3], 1 }
 0x394   :  { %624 = vsyncpa [#allocation3 + $0x1], 1 }
 0x395   :  { %625 = vsyncpa [#allocation6], 1 }
 0x396   :  { %627 = vsyncpa [#allocation6 + $0x1], 1 }
 0x397   :  { %628 = vsyncpa [#allocation4], 1 }
 0x398   :  { %630 = vsyncpa [#allocation4 + $0x1], 1 }
 0x399   :  { %631 = vsyncpa [#allocation10], 1 }
 0x39a   :  { %633 = vsyncpa [#allocation10 + $0x1], 1 }

</bundles_post_ra>
